<compile_context>
chip_gen: v7x
topology: tpu7x:2x2x1
jax: 0.10.0
libtpu: 0.0.40
codegen_flags: <defaults>
</compile_context>

<pallas_src>
import math

import jax
import jax.numpy as jnp
from jax import lax
from jax.experimental import pallas as pl
from jax.experimental.pallas import tpu as pltpu


def _global_pointer_kernel(x_ref, w_ref, b_ref, cos_ref, sina_ref, sinb_ref,
                           mrow_ref, mcol_ref, out_ref,
                           q_scr, k_scr, keep_ref, pen_ref):
    heads, N, hd = q_scr.shape
    O = 2 * heads * hd
    Hb = out_ref.shape[1]                      # heads per grid step (static)
    hb = pl.program_id(1)                      # head-block index (innermost axis)

    scale = jnp.float32(1.0 / math.sqrt(hd))
    neg = jnp.float32(-1.0e12)
    big = jnp.float32(1.0e12)

    # ---- once per batch element (head-block 0): projection + RoPE + mask algebra
    @pl.when(hb == 0)
    def _per_batch_setup():
        x = x_ref[0]                                           # (N, D) bf16
        # One wide MXU matmul over all heads at once, f32 accumulate.
        p = jnp.dot(x, w_ref[...],
                    preferred_element_type=jnp.float32) + b_ref[...]   # (N, O)
        # RoPE with the pair-swap expressed as two lane rotations; the swap's
        # sign and even/odd selection are pre-folded into sin_a / sin_b, so
        # wrap-around lanes are multiplied by zero and never leak.
        pr = (p * cos_ref[...]
              + pltpu.roll(p, shift=O - 1, axis=1) * sina_ref[...]
              + pltpu.roll(p, shift=1, axis=1) * sinb_ref[...])
        # Split per-head q / k bands into bf16 scratches (setup-only slices).
        for h in range(heads):
            base = h * 2 * hd
            q_scr[h] = pr[:, base:base + hd].astype(q_scr.dtype)
            k_scr[h] = pr[:, base + hd:base + 2 * hd].astype(k_scr.dtype)

        # Fold mask + tril + 1/sqrt(hd) into keep/pen so head steps are an FMA:
        #   out = logits*keep + pen  ==  ((L*mc + neg*(1-mc))*mr + neg*(1-mr)
        #                                 - tril*big) * scale
        m_col = mcol_ref[0]                    # (N, 1) mask over query axis m
        m_row = mrow_ref[0]                    # (1, N) mask over key axis n
        row = lax.broadcasted_iota(jnp.int32, (N, N), 0)
        col = lax.broadcasted_iota(jnp.int32, (N, N), 1)
        tril = (row > col).astype(jnp.float32)            # torch.tril(ones, -1)
        keep_ref[...] = (m_col * m_row) * scale
        pen_ref[...] = (neg * (1.0 - m_col) * m_row
                        + neg * (1.0 - m_row)
                        - tril * big) * scale

    # ---- every grid step: Hb heads, each one matmul + one FMA + store
    keep = keep_ref[...]
    pen = pen_ref[...]
    for j in range(Hb):
        h_abs = hb * Hb + j                    # dynamic leading index into scratch
        # logits[m, n] = sum_d q[m, d] * k[n, d]
        logits = lax.dot_general(q_scr[h_abs], k_scr[h_abs],
                                 (((1,), (1,)), ((), ())),
                                 preferred_element_type=jnp.float32)
        out_ref[0, j] = (logits * keep + pen).astype(out_ref.dtype)


def global_pointer_pallas(x, W, b, mask, heads, head_size, *,
                          block_heads=None, out_dtype=jnp.float32):
    B, N, D = x.shape
    hd = head_size
    O = 2 * heads * hd
    assert W.shape == (O, D) and b.shape == (O,)
    assert hd % 2 == 0

    if block_heads is None:
        block_heads = heads
        if heads > 8:
            for cand in (8, 6, 4, 3, 2, 1):
                if heads % cand == 0:
                    block_heads = cand
                    break
    assert heads % block_heads == 0
    n_hblocks = heads // block_heads

    # ---------- glue: constants / layout plumbing (outside the kernel) ----------
    x_bf = x.astype(jnp.bfloat16)
    w1 = W.T.astype(jnp.bfloat16)                                  # (D, O)
    b1 = b.astype(jnp.float32).reshape(1, O)

    pos_ids = jnp.arange(N, dtype=jnp.float32)
    idx = jnp.arange(hd // 2, dtype=jnp.float32)
    theta = jnp.power(10000.0, -2.0 * idx / hd)
    ang = pos_ids[:, None] * theta[None, :]                        # (N, hd//2)
    # torch's `.repeat(1,1,1,2)` TILES (does not interleave) the half tables.
    cos_hd = jnp.concatenate([jnp.cos(ang), jnp.cos(ang)], axis=-1)    # (N, hd)
    sin_hd = jnp.concatenate([jnp.sin(ang), jnp.sin(ang)], axis=-1)    # (N, hd)
    cos_full = jnp.tile(cos_hd, (1, 2 * heads))                    # (N, O)
    sin_full = jnp.tile(sin_hd, (1, 2 * heads))                    # (N, O)
    # Pair-swap sign & parity folded into the sin tables:
    #   swap(p)[2j] = -p[2j+1]  -> sin_a nonzero (negated) on even columns
    #   swap(p)[2j+1] = +p[2j]  -> sin_b nonzero on odd columns
    even = (jnp.arange(O) % 2 == 0).astype(jnp.float32)[None, :]   # (1, O)
    sin_a = sin_full * (-even)
    sin_b = sin_full * (1.0 - even)

    mask_f = mask.astype(jnp.float32)
    mask_row = mask_f.reshape(B, 1, N)
    mask_col = mask_f.reshape(B, N, 1)

    flops = B * (2 * N * D * O + 2 * heads * N * N * hd)
    bytes_accessed = (x_bf.size * 2 + w1.size * 2 + b1.size * 4
                      + (cos_full.size + sin_a.size + sin_b.size) * 4
                      + (mask_row.size + mask_col.size) * 4
                      + B * heads * N * N * jnp.dtype(out_dtype).itemsize)

    out_shape = jax.ShapeDtypeStruct((B, heads, N, N), out_dtype)
    return pl.pallas_call(
        _global_pointer_kernel,
        out_shape=out_shape,
        grid=(B, n_hblocks),
        in_specs=[
            pl.BlockSpec((1, N, D), lambda bi, hi: (bi, 0, 0)),        # x (bf16)
            pl.BlockSpec((D, O), lambda bi, hi: (0, 0)),               # W^T (bf16), resident
            pl.BlockSpec((1, O), lambda bi, hi: (0, 0)),               # bias (f32)
            pl.BlockSpec((N, O), lambda bi, hi: (0, 0)),               # cos table
            pl.BlockSpec((N, O), lambda bi, hi: (0, 0)),               # signed sin (even cols)
            pl.BlockSpec((N, O), lambda bi, hi: (0, 0)),               # signed sin (odd cols)
            pl.BlockSpec((1, 1, N), lambda bi, hi: (bi, 0, 0)),        # mask (row form)
            pl.BlockSpec((1, N, 1), lambda bi, hi: (bi, 0, 0)),        # mask (col form)
        ],
        out_specs=pl.BlockSpec((1, block_heads, N, N),
                               lambda bi, hi: (bi, hi, 0, 0)),
        scratch_shapes=[
            pltpu.VMEM((heads, N, hd), jnp.bfloat16),   # rotated q per head
            pltpu.VMEM((heads, N, hd), jnp.bfloat16),   # rotated k per head
            pltpu.VMEM((N, N), jnp.float32),            # keep = m_col*m_row*scale
            pltpu.VMEM((N, N), jnp.float32),            # pen  = combined penalties*scale
        ],
        compiler_params=pltpu.CompilerParams(
            # Head-block axis MUST stay innermost + "arbitrary": scratches carry
            # per-batch state across it. Batch axis is megacore-parallel.
            dimension_semantics=("parallel", "arbitrary"),
            vmem_limit_bytes=64 * 1024 * 1024),
        cost_estimate=pl.CostEstimate(flops=flops, transcendentals=0,
                                      bytes_accessed=bytes_accessed),
    )(x_bf, w1, b1, cos_full, sin_a, sin_b, mask_row, mask_col)


def global_pointer_ref(x, W, b, mask, heads, head_size):
    """Plain-JAX mirror of the PyTorch forward (for verification)."""
    B, N, D = x.shape
    hd = head_size
    proj = jnp.einsum('bnd,od->bno', x, W, precision=lax.Precision.HIGHEST) + b
    proj = proj.reshape(B, N, heads, 2 * hd)
    qw, kw = proj[..., :hd], proj[..., hd:]
    pos_ids = jnp.arange(N, dtype=jnp.float32)
    idx = jnp.arange(hd // 2, dtype=jnp.float32)
    theta = jnp.power(10000.0, -2.0 * idx / hd)
    ang = pos_ids[:, None] * theta[None, :]
    pos = jnp.stack([jnp.sin(ang), jnp.cos(ang)], axis=-1).reshape(1, N, hd)
    cos_pos = jnp.tile(pos[..., None, 1::2], (1, 1, 1, 2))
    sin_pos = jnp.tile(pos[..., None, ::2], (1, 1, 1, 2))
    qw2 = jnp.stack([-qw[..., 1::2], qw[..., ::2]], axis=4).reshape(qw.shape)
    qw_r = qw * cos_pos + qw2 * sin_pos
    kw2 = jnp.stack([-kw[..., 1::2], kw[..., ::2]], axis=4).reshape(kw.shape)
    kw_r = kw * cos_pos + kw2 * sin_pos
    logits = jnp.einsum('bmhd,bnhd->bhmn', qw_r, kw_r, precision=lax.Precision.HIGHEST)
    mf = mask.astype(jnp.float32)
    logits = logits * mf[:, None, :, None] + (-1e12) * (1 - mf[:, None, :, None])
    logits = logits * mf[:, None, None, :] + (-1e12) * (1 - mf[:, None, None, :])
    tril = jnp.tril(jnp.ones((N, N), jnp.float32), k=-1)
    logits = logits - tril * 1e12
    return logits / hd ** 0.5


if __name__ == "__main__":
    B, N, D = 2, 8, 32
    heads, head_size = 4, 16           # O = 2*heads*head_size = 128 (lane aligned)

    key = jax.random.PRNGKey(0)
    kx, kw_, kb = jax.random.split(key, 3)
    x = jax.random.normal(kx, (B, N, D), jnp.float32)
    # nn.Linear(hidden_size, heads*head_size*2): weight (out, in), bias (out,)
    W = jax.random.normal(kw_, (2 * heads * head_size, D), jnp.float32) * 0.05
    b = jax.random.normal(kb, (2 * heads * head_size,), jnp.float32) * 0.01
    lengths = jnp.array([8, 5])
    mask = (jnp.arange(N)[None, :] < lengths[:, None]).astype(jnp.float32)  # (B, N)

    out = global_pointer_pallas(x, W, b, mask, heads, head_size, block_heads=2)
    out = jax.block_until_ready(out)

    ref = global_pointer_ref(x, W, b, mask, heads, head_size)
    assert out.shape == (B, heads, N, N)
    err = float(jnp.max(jnp.abs(out - ref) / (jnp.abs(ref) + 1.0)))
    assert err < 1e-2, f"max relative error {err}"
    print("KERNEL_OK")
</pallas_src>

<mosaic_0001>
module attributes {stable_mosaic.version = 11 : i64} {
  func.func @_global_pointer_kernel(%arg0: i32, %arg1: i32, %arg2: memref<1x8x32xbf16, #tpu.memory_space<vmem>>, %arg3: memref<32x128xbf16, #tpu.memory_space<vmem>>, %arg4: memref<1x128xf32, #tpu.memory_space<vmem>>, %arg5: memref<8x128xf32, #tpu.memory_space<vmem>>, %arg6: memref<8x128xf32, #tpu.memory_space<vmem>>, %arg7: memref<8x128xf32, #tpu.memory_space<vmem>>, %arg8: memref<1x1x8xf32, #tpu.memory_space<vmem>>, %arg9: memref<1x8x1xf32, #tpu.memory_space<vmem>>, %arg10: memref<1x2x8x8xf32, #tpu.memory_space<vmem>>, %arg11: memref<4x8x16xbf16, #tpu.memory_space<vmem>>, %arg12: memref<4x8x16xbf16, #tpu.memory_space<vmem>>, %arg13: memref<8x8xf32, #tpu.memory_space<vmem>>, %arg14: memref<8x8xf32, #tpu.memory_space<vmem>>) attributes {dimension_semantics = [#tpu.dimension_semantics<parallel>, #tpu.dimension_semantics<arbitrary>], iteration_bounds = array<i64: 2, 2>, scalar_prefetch = 0 : i64, scratch_operands = 4 : i64, tpu.core_type = #tpu.core_type<tc>, window_params = [{transform_indices = @transform_0, window_bounds = array<i64: 1, 8, 32>}, {pipeline_mode = #tpu.pipeline_mode<synchronous>, transform_indices = @transform_1, window_bounds = array<i64: 32, 128>}, {pipeline_mode = #tpu.pipeline_mode<synchronous>, transform_indices = @transform_2, window_bounds = array<i64: 1, 128>}, {pipeline_mode = #tpu.pipeline_mode<synchronous>, transform_indices = @transform_3, window_bounds = array<i64: 8, 128>}, {pipeline_mode = #tpu.pipeline_mode<synchronous>, transform_indices = @transform_4, window_bounds = array<i64: 8, 128>}, {pipeline_mode = #tpu.pipeline_mode<synchronous>, transform_indices = @transform_5, window_bounds = array<i64: 8, 128>}, {transform_indices = @transform_6, window_bounds = array<i64: 1, 1, 8>}, {transform_indices = @transform_7, window_bounds = array<i64: 1, 8, 1>}, {transform_indices = @transform_8, window_bounds = array<i64: 1, 2, 8, 8>}]} {
    %c0_i32 = arith.constant 0 : i32
    %0 = arith.cmpi eq, %arg1, %c0_i32 : i32
    %1 = arith.extui %0 : i1 to i32
    %cst = arith.constant 2.500000e-01 : f32
    %cst_0 = arith.constant -9.99999995E+11 : f32
    %cst_1 = arith.constant 9.99999995E+11 : f32
    %c0_i32_2 = arith.constant 0 : i32
    %2 = arith.cmpi ne, %1, %c0_i32_2 : i32
    scf.if %2 {
      %c0_25 = arith.constant 0 : index
      %c0_26 = arith.constant 0 : index
      %c0_27 = arith.constant 0 : index
      %33 = vector.load %arg2[%c0_25, %c0_26, %c0_27] : memref<1x8x32xbf16, #tpu.memory_space<vmem>>, vector<1x8x32xbf16>
      %34 = vector.shape_cast %33 : vector<1x8x32xbf16> to vector<8x32xbf16>
      %c0_28 = arith.constant 0 : index
      %c0_29 = arith.constant 0 : index
      %35 = vector.load %arg3[%c0_28, %c0_29] : memref<32x128xbf16, #tpu.memory_space<vmem>>, vector<32x128xbf16>
      %cst_30 = arith.constant dense<0.000000e+00> : vector<8x128xf32>
      %36 = tpu.matmul %34, %35, %cst_30 {dimension_numbers = #tpu.dot_dimension_numbers<[1], [0], [0], [1], [0, 0, 1, 1], [], []>} : vector<8x32xbf16>, vector<32x128xbf16>, vector<8x128xf32> -> vector<8x128xf32>
      %c0_31 = arith.constant 0 : index
      %c0_32 = arith.constant 0 : index
      %37 = vector.load %arg4[%c0_31, %c0_32] : memref<1x128xf32, #tpu.memory_space<vmem>>, vector<1x128xf32>
      %38 = vector.broadcast %37 : vector<1x128xf32> to vector<8x128xf32>
      %39 = arith.addf %36, %38 : vector<8x128xf32>
      %c0_33 = arith.constant 0 : index
      %c0_34 = arith.constant 0 : index
      %40 = vector.load %arg5[%c0_33, %c0_34] : memref<8x128xf32, #tpu.memory_space<vmem>>, vector<8x128xf32>
      %41 = arith.mulf %39, %40 : vector<8x128xf32>
      %c127_i32 = arith.constant 127 : i32
      %42 = tpu.dynamic_rotate %39 by %c127_i32 dim 1 : vector<8x128xf32>, i32 -> vector<8x128xf32>
      %c0_35 = arith.constant 0 : index
      %c0_36 = arith.constant 0 : index
      %43 = vector.load %arg6[%c0_35, %c0_36] : memref<8x128xf32, #tpu.memory_space<vmem>>, vector<8x128xf32>
      %44 = arith.mulf %42, %43 : vector<8x128xf32>
      %45 = arith.addf %41, %44 : vector<8x128xf32>
      %c1_i32_37 = arith.constant 1 : i32
      %46 = tpu.dynamic_rotate %39 by %c1_i32_37 dim 1 : vector<8x128xf32>, i32 -> vector<8x128xf32>
      %c0_38 = arith.constant 0 : index
      %c0_39 = arith.constant 0 : index
      %47 = vector.load %arg7[%c0_38, %c0_39] : memref<8x128xf32, #tpu.memory_space<vmem>>, vector<8x128xf32>
      %48 = arith.mulf %46, %47 : vector<8x128xf32>
      %49 = arith.addf %45, %48 : vector<8x128xf32>
      %50 = vector.extract_strided_slice %49 {offsets = [0, 0], sizes = [8, 16], strides = [1, 1]} : vector<8x128xf32> to vector<8x16xf32>
      %51 = arith.truncf %50 : vector<8x16xf32> to vector<8x16xbf16>
      %c0_40 = arith.constant 0 : index
      %c0_41 = arith.constant 0 : index
      %c0_42 = arith.constant 0 : index
      %52 = vector.load %arg11[%c0_40, %c0_41, %c0_42] : memref<4x8x16xbf16, #tpu.memory_space<vmem>>, vector<1x8x16xbf16>
      %53 = vector.shape_cast %52 : vector<1x8x16xbf16> to vector<8x16xbf16>
      %54 = vector.shape_cast %51 : vector<8x16xbf16> to vector<1x8x16xbf16>
      tpu.vector_store %arg11[%c0_40, %c0_41, %c0_42], %54 {strides = array<i32>} : memref<4x8x16xbf16, #tpu.memory_space<vmem>>, vector<1x8x16xbf16>,
      %55 = vector.extract_strided_slice %49 {offsets = [0, 16], sizes = [8, 16], strides = [1, 1]} : vector<8x128xf32> to vector<8x16xf32>
      %56 = arith.truncf %55 : vector<8x16xf32> to vector<8x16xbf16>
      %c0_43 = arith.constant 0 : index
      %c0_44 = arith.constant 0 : index
      %c0_45 = arith.constant 0 : index
      %57 = vector.load %arg12[%c0_43, %c0_44, %c0_45] : memref<4x8x16xbf16, #tpu.memory_space<vmem>>, vector<1x8x16xbf16>
      %58 = vector.shape_cast %57 : vector<1x8x16xbf16> to vector<8x16xbf16>
      %59 = vector.shape_cast %56 : vector<8x16xbf16> to vector<1x8x16xbf16>
      tpu.vector_store %arg12[%c0_43, %c0_44, %c0_45], %59 {strides = array<i32>} : memref<4x8x16xbf16, #tpu.memory_space<vmem>>, vector<1x8x16xbf16>,
      %60 = vector.extract_strided_slice %49 {offsets = [0, 32], sizes = [8, 16], strides = [1, 1]} : vector<8x128xf32> to vector<8x16xf32>
      %61 = arith.truncf %60 : vector<8x16xf32> to vector<8x16xbf16>
      %c1_46 = arith.constant 1 : index
      %c0_47 = arith.constant 0 : index
      %c0_48 = arith.constant 0 : index
      %62 = vector.load %arg11[%c1_46, %c0_47, %c0_48] : memref<4x8x16xbf16, #tpu.memory_space<vmem>>, vector<1x8x16xbf16>
      %63 = vector.shape_cast %62 : vector<1x8x16xbf16> to vector<8x16xbf16>
      %64 = vector.shape_cast %61 : vector<8x16xbf16> to vector<1x8x16xbf16>
      tpu.vector_store %arg11[%c1_46, %c0_47, %c0_48], %64 {strides = array<i32>} : memref<4x8x16xbf16, #tpu.memory_space<vmem>>, vector<1x8x16xbf16>,
      %65 = vector.extract_strided_slice %49 {offsets = [0, 48], sizes = [8, 16], strides = [1, 1]} : vector<8x128xf32> to vector<8x16xf32>
      %66 = arith.truncf %65 : vector<8x16xf32> to vector<8x16xbf16>
      %c1_49 = arith.constant 1 : index
      %c0_50 = arith.constant 0 : index
      %c0_51 = arith.constant 0 : index
      %67 = vector.load %arg12[%c1_49, %c0_50, %c0_51] : memref<4x8x16xbf16, #tpu.memory_space<vmem>>, vector<1x8x16xbf16>
      %68 = vector.shape_cast %67 : vector<1x8x16xbf16> to vector<8x16xbf16>
      %69 = vector.shape_cast %66 : vector<8x16xbf16> to vector<1x8x16xbf16>
      tpu.vector_store %arg12[%c1_49, %c0_50, %c0_51], %69 {strides = array<i32>} : memref<4x8x16xbf16, #tpu.memory_space<vmem>>, vector<1x8x16xbf16>,
      %70 = vector.extract_strided_slice %49 {offsets = [0, 64], sizes = [8, 16], strides = [1, 1]} : vector<8x128xf32> to vector<8x16xf32>
      %71 = arith.truncf %70 : vector<8x16xf32> to vector<8x16xbf16>
      %c2 = arith.constant 2 : index
      %c0_52 = arith.constant 0 : index
      %c0_53 = arith.constant 0 : index
      %72 = vector.load %arg11[%c2, %c0_52, %c0_53] : memref<4x8x16xbf16, #tpu.memory_space<vmem>>, vector<1x8x16xbf16>
      %73 = vector.shape_cast %72 : vector<1x8x16xbf16> to vector<8x16xbf16>
      %74 = vector.shape_cast %71 : vector<8x16xbf16> to vector<1x8x16xbf16>
      tpu.vector_store %arg11[%c2, %c0_52, %c0_53], %74 {strides = array<i32>} : memref<4x8x16xbf16, #tpu.memory_space<vmem>>, vector<1x8x16xbf16>,
      %75 = vector.extract_strided_slice %49 {offsets = [0, 80], sizes = [8, 16], strides = [1, 1]} : vector<8x128xf32> to vector<8x16xf32>
      %76 = arith.truncf %75 : vector<8x16xf32> to vector<8x16xbf16>
      %c2_54 = arith.constant 2 : index
      %c0_55 = arith.constant 0 : index
      %c0_56 = arith.constant 0 : index
      %77 = vector.load %arg12[%c2_54, %c0_55, %c0_56] : memref<4x8x16xbf16, #tpu.memory_space<vmem>>, vector<1x8x16xbf16>
      %78 = vector.shape_cast %77 : vector<1x8x16xbf16> to vector<8x16xbf16>
      %79 = vector.shape_cast %76 : vector<8x16xbf16> to vector<1x8x16xbf16>
      tpu.vector_store %arg12[%c2_54, %c0_55, %c0_56], %79 {strides = array<i32>} : memref<4x8x16xbf16, #tpu.memory_space<vmem>>, vector<1x8x16xbf16>,
      %80 = vector.extract_strided_slice %49 {offsets = [0, 96], sizes = [8, 16], strides = [1, 1]} : vector<8x128xf32> to vector<8x16xf32>
      %81 = arith.truncf %80 : vector<8x16xf32> to vector<8x16xbf16>
      %c3 = arith.constant 3 : index
      %c0_57 = arith.constant 0 : index
      %c0_58 = arith.constant 0 : index
      %82 = vector.load %arg11[%c3, %c0_57, %c0_58] : memref<4x8x16xbf16, #tpu.memory_space<vmem>>, vector<1x8x16xbf16>
      %83 = vector.shape_cast %82 : vector<1x8x16xbf16> to vector<8x16xbf16>
      %84 = vector.shape_cast %81 : vector<8x16xbf16> to vector<1x8x16xbf16>
      tpu.vector_store %arg11[%c3, %c0_57, %c0_58], %84 {strides = array<i32>} : memref<4x8x16xbf16, #tpu.memory_space<vmem>>, vector<1x8x16xbf16>,
      %85 = vector.extract_strided_slice %49 {offsets = [0, 112], sizes = [8, 16], strides = [1, 1]} : vector<8x128xf32> to vector<8x16xf32>
      %86 = arith.truncf %85 : vector<8x16xf32> to vector<8x16xbf16>
      %c3_59 = arith.constant 3 : index
      %c0_60 = arith.constant 0 : index
      %c0_61 = arith.constant 0 : index
      %87 = vector.load %arg12[%c3_59, %c0_60, %c0_61] : memref<4x8x16xbf16, #tpu.memory_space<vmem>>, vector<1x8x16xbf16>
      %88 = vector.shape_cast %87 : vector<1x8x16xbf16> to vector<8x16xbf16>
      %89 = vector.shape_cast %86 : vector<8x16xbf16> to vector<1x8x16xbf16>
      tpu.vector_store %arg12[%c3_59, %c0_60, %c0_61], %89 {strides = array<i32>} : memref<4x8x16xbf16, #tpu.memory_space<vmem>>, vector<1x8x16xbf16>,
      %c0_62 = arith.constant 0 : index
      %c0_63 = arith.constant 0 : index
      %c0_64 = arith.constant 0 : index
      %90 = vector.load %arg9[%c0_62, %c0_63, %c0_64] : memref<1x8x1xf32, #tpu.memory_space<vmem>>, vector<1x8x1xf32>
      %91 = vector.shape_cast %90 : vector<1x8x1xf32> to vector<8x1xf32>
      %c0_65 = arith.constant 0 : index
      %c0_66 = arith.constant 0 : index
      %c0_67 = arith.constant 0 : index
      %92 = vector.load %arg8[%c0_65, %c0_66, %c0_67] : memref<1x1x8xf32, #tpu.memory_space<vmem>>, vector<1x1x8xf32>
      %93 = vector.shape_cast %92 : vector<1x1x8xf32> to vector<1x8xf32>
      %94 = tpu.iota {dimensions = array<i32: 0>} : vector<8x8xi32>
      %95 = tpu.iota {dimensions = array<i32: 1>} : vector<8x8xi32>
      %96 = arith.cmpi sgt, %94, %95 : vector<8x8xi32>
      %97 = arith.extui %96 : vector<8x8xi1> to vector<8x8xi32>
      %98 = arith.sitofp %97 : vector<8x8xi32> to vector<8x8xf32>
      %99 = vector.broadcast %91 : vector<8x1xf32> to vector<8x8xf32>
      %100 = vector.broadcast %93 : vector<1x8xf32> to vector<8x8xf32>
      %101 = arith.mulf %99, %100 : vector<8x8xf32>
      %102 = vector.broadcast %cst : f32 to vector<8x8xf32>
      %103 = arith.mulf %101, %102 : vector<8x8xf32>
      %c0_68 = arith.constant 0 : index
      %c0_69 = arith.constant 0 : index
      %104 = vector.load %arg13[%c0_68, %c0_69] : memref<8x8xf32, #tpu.memory_space<vmem>>, vector<8x8xf32>
      tpu.vector_store %arg13[%c0_68, %c0_69], %103 {strides = array<i32>} : memref<8x8xf32, #tpu.memory_space<vmem>>, vector<8x8xf32>,
      %cst_70 = arith.constant 1.000000e+00 : f32
      %105 = vector.broadcast %cst_70 : f32 to vector<8x1xf32>
      %106 = arith.subf %105, %91 : vector<8x1xf32>
      %107 = vector.broadcast %cst_0 : f32 to vector<8x1xf32>
      %108 = arith.mulf %107, %106 : vector<8x1xf32>
      %109 = vector.broadcast %108 : vector<8x1xf32> to vector<8x8xf32>
      %110 = vector.broadcast %93 : vector<1x8xf32> to vector<8x8xf32>
      %111 = arith.mulf %109, %110 : vector<8x8xf32>
      %cst_71 = arith.constant 1.000000e+00 : f32
      %112 = vector.broadcast %cst_71 : f32 to vector<1x8xf32>
      %113 = arith.subf %112, %93 : vector<1x8xf32>
      %114 = vector.broadcast %cst_0 : f32 to vector<1x8xf32>
      %115 = arith.mulf %114, %113 : vector<1x8xf32>
      %116 = vector.broadcast %115 : vector<1x8xf32> to vector<8x8xf32>
      %117 = arith.addf %111, %116 : vector<8x8xf32>
      %118 = vector.broadcast %cst_1 : f32 to vector<8x8xf32>
      %119 = arith.mulf %98, %118 : vector<8x8xf32>
      %120 = arith.subf %117, %119 : vector<8x8xf32>
      %121 = vector.broadcast %cst : f32 to vector<8x8xf32>
      %122 = arith.mulf %120, %121 : vector<8x8xf32>
      %c0_72 = arith.constant 0 : index
      %c0_73 = arith.constant 0 : index
      %123 = vector.load %arg14[%c0_72, %c0_73] : memref<8x8xf32, #tpu.memory_space<vmem>>, vector<8x8xf32>
      tpu.vector_store %arg14[%c0_72, %c0_73], %122 {strides = array<i32>} : memref<8x8xf32, #tpu.memory_space<vmem>>, vector<8x8xf32>,
    } else {
    }
    %c0 = arith.constant 0 : index
    %c0_3 = arith.constant 0 : index
    %3 = vector.load %arg13[%c0, %c0_3] : memref<8x8xf32, #tpu.memory_space<vmem>>, vector<8x8xf32>
    %c0_4 = arith.constant 0 : index
    %c0_5 = arith.constant 0 : index
    %4 = vector.load %arg14[%c0_4, %c0_5] : memref<8x8xf32, #tpu.memory_space<vmem>>, vector<8x8xf32>
    %c2_i32 = arith.constant 2 : i32
    %5 = arith.muli %arg1, %c2_i32 : i32
    %c0_i32_6 = arith.constant 0 : i32
    %6 = arith.addi %5, %c0_i32_6 : i32
    %7 = arith.index_cast %6 : i32 to index
    %c0_7 = arith.constant 0 : index
    %c0_8 = arith.constant 0 : index
    %8 = vector.load %arg11[%7, %c0_7, %c0_8] : memref<4x8x16xbf16, #tpu.memory_space<vmem>>, vector<1x8x16xbf16>
    %9 = vector.shape_cast %8 : vector<1x8x16xbf16> to vector<8x16xbf16>
    %10 = arith.index_cast %6 : i32 to index
    %c0_9 = arith.constant 0 : index
    %c0_10 = arith.constant 0 : index
    %11 = vector.load %arg12[%10, %c0_9, %c0_10] : memref<4x8x16xbf16, #tpu.memory_space<vmem>>, vector<1x8x16xbf16>
    %12 = vector.shape_cast %11 : vector<1x8x16xbf16> to vector<8x16xbf16>
    %cst_11 = arith.constant dense<0.000000e+00> : vector<8x8xf32>
    %13 = tpu.matmul %9, %12, %cst_11 {dimension_numbers = #tpu.dot_dimension_numbers<[1], [1], [0], [0], [0, 0, 1, 0], [], []>} : vector<8x16xbf16>, vector<8x16xbf16>, vector<8x8xf32> -> vector<8x8xf32>
    %14 = arith.mulf %13, %3 : vector<8x8xf32>
    %15 = arith.addf %14, %4 : vector<8x8xf32>
    %c0_12 = arith.constant 0 : index
    %c0_13 = arith.constant 0 : index
    %c0_14 = arith.constant 0 : index
    %c0_15 = arith.constant 0 : index
    %16 = vector.load %arg10[%c0_12, %c0_13, %c0_14, %c0_15] : memref<1x2x8x8xf32, #tpu.memory_space<vmem>>, vector<1x1x8x8xf32>
    %17 = vector.shape_cast %16 : vector<1x1x8x8xf32> to vector<8x8xf32>
    %18 = vector.shape_cast %15 : vector<8x8xf32> to vector<1x1x8x8xf32>
    tpu.vector_store %arg10[%c0_12, %c0_13, %c0_14, %c0_15], %18 {strides = array<i32>} : memref<1x2x8x8xf32, #tpu.memory_space<vmem>>, vector<1x1x8x8xf32>,
    %c2_i32_16 = arith.constant 2 : i32
    %19 = arith.muli %arg1, %c2_i32_16 : i32
    %c1_i32 = arith.constant 1 : i32
    %20 = arith.addi %19, %c1_i32 : i32
    %21 = arith.index_cast %20 : i32 to index
    %c0_17 = arith.constant 0 : index
    %c0_18 = arith.constant 0 : index
    %22 = vector.load %arg11[%21, %c0_17, %c0_18] : memref<4x8x16xbf16, #tpu.memory_space<vmem>>, vector<1x8x16xbf16>
    %23 = vector.shape_cast %22 : vector<1x8x16xbf16> to vector<8x16xbf16>
    %24 = arith.index_cast %20 : i32 to index
    %c0_19 = arith.constant 0 : index
    %c0_20 = arith.constant 0 : index
    %25 = vector.load %arg12[%24, %c0_19, %c0_20] : memref<4x8x16xbf16, #tpu.memory_space<vmem>>, vector<1x8x16xbf16>
    %26 = vector.shape_cast %25 : vector<1x8x16xbf16> to vector<8x16xbf16>
    %cst_21 = arith.constant dense<0.000000e+00> : vector<8x8xf32>
    %27 = tpu.matmul %23, %26, %cst_21 {dimension_numbers = #tpu.dot_dimension_numbers<[1], [1], [0], [0], [0, 0, 1, 0], [], []>} : vector<8x16xbf16>, vector<8x16xbf16>, vector<8x8xf32> -> vector<8x8xf32>
    %28 = arith.mulf %27, %3 : vector<8x8xf32>
    %29 = arith.addf %28, %4 : vector<8x8xf32>
    %c0_22 = arith.constant 0 : index
    %c1 = arith.constant 1 : index
    %c0_23 = arith.constant 0 : index
    %c0_24 = arith.constant 0 : index
    %30 = vector.load %arg10[%c0_22, %c1, %c0_23, %c0_24] : memref<1x2x8x8xf32, #tpu.memory_space<vmem>>, vector<1x1x8x8xf32>
    %31 = vector.shape_cast %30 : vector<1x1x8x8xf32> to vector<8x8xf32>
    %32 = vector.shape_cast %29 : vector<8x8xf32> to vector<1x1x8x8xf32>
    tpu.vector_store %arg10[%c0_22, %c1, %c0_23, %c0_24], %32 {strides = array<i32>} : memref<1x2x8x8xf32, #tpu.memory_space<vmem>>, vector<1x1x8x8xf32>,
    return
  }
  func.func @transform_0(%arg0: i32, %arg1: i32) -> (i32, i32, i32) {
    %c0_i32 = arith.constant 0 : i32
    %c0_i32_0 = arith.constant 0 : i32
    %c0_i32_1 = arith.constant 0 : i32
    return %arg0, %c0_i32, %c0_i32_0 : i32, i32, i32
  }
  func.func @transform_1(%arg0: i32, %arg1: i32) -> (i32, i32) {
    %c0_i32 = arith.constant 0 : i32
    %c0_i32_0 = arith.constant 0 : i32
    %c0_i32_1 = arith.constant 0 : i32
    return %c0_i32, %c0_i32_0 : i32, i32
  }
  func.func @transform_2(%arg0: i32, %arg1: i32) -> (i32, i32) {
    %c0_i32 = arith.constant 0 : i32
    %c0_i32_0 = arith.constant 0 : i32
    %c0_i32_1 = arith.constant 0 : i32
    return %c0_i32, %c0_i32_0 : i32, i32
  }
  func.func @transform_3(%arg0: i32, %arg1: i32) -> (i32, i32) {
    %c0_i32 = arith.constant 0 : i32
    %c0_i32_0 = arith.constant 0 : i32
    %c0_i32_1 = arith.constant 0 : i32
    return %c0_i32, %c0_i32_0 : i32, i32
  }
  func.func @transform_4(%arg0: i32, %arg1: i32) -> (i32, i32) {
    %c0_i32 = arith.constant 0 : i32
    %c0_i32_0 = arith.constant 0 : i32
    %c0_i32_1 = arith.constant 0 : i32
    return %c0_i32, %c0_i32_0 : i32, i32
  }
  func.func @transform_5(%arg0: i32, %arg1: i32) -> (i32, i32) {
    %c0_i32 = arith.constant 0 : i32
    %c0_i32_0 = arith.constant 0 : i32
    %c0_i32_1 = arith.constant 0 : i32
    return %c0_i32, %c0_i32_0 : i32, i32
  }
  func.func @transform_6(%arg0: i32, %arg1: i32) -> (i32, i32, i32) {
    %c0_i32 = arith.constant 0 : i32
    %c0_i32_0 = arith.constant 0 : i32
    %c0_i32_1 = arith.constant 0 : i32
    return %arg0, %c0_i32, %c0_i32_0 : i32, i32, i32
  }
  func.func @transform_7(%arg0: i32, %arg1: i32) -> (i32, i32, i32) {
    %c0_i32 = arith.constant 0 : i32
    %c0_i32_0 = arith.constant 0 : i32
    %c0_i32_1 = arith.constant 0 : i32
    return %arg0, %c0_i32, %c0_i32_0 : i32, i32, i32
  }
  func.func @transform_8(%arg0: i32, %arg1: i32) -> (i32, i32, i32, i32) {
    %c0_i32 = arith.constant 0 : i32
    %c0_i32_0 = arith.constant 0 : i32
    %c0_i32_1 = arith.constant 0 : i32
    return %arg0, %arg1, %c0_i32, %c0_i32_0 : i32, i32, i32, i32
  }
}

</mosaic_0001>

<bundles_post_ra>
// kernel: tpu_custom_call.1
= control target key start
LH: loop header
LB: loop body
LE: loop exit
PB: predicated region body
PF: predicated region fallthrough
CT: control target
= control target key end

     0   :  { %s2126_s0 = inlined_call_operand.hbm [shape: bf16[2,8,32], index: 0, kind: input, shape index: {}]   ;;  %s2127_s1 = inlined_call_operand.hbm [shape: bf16[32,128], index: 1, kind: input, shape index: {}]   ;;  %s2128_s2 = inlined_call_operand.hbm [shape: f32[1,128], index: 2, kind: input, shape index: {}]   ;;  %s2129_s3 = inlined_call_operand.hbm [shape: f32[8,128], index: 3, kind: input, shape index: {}]   ;;  %s2130_s4 = inlined_call_operand.hbm [shape: f32[8,128], index: 4, kind: input, shape index: {}]   ;;  %s2131_s5 = inlined_call_operand.hbm [shape: f32[8,128], index: 5, kind: input, shape index: {}]   ;;  %s2132_s6 = inlined_call_operand.hbm [shape: f32[2,1,8], index: 6, kind: input, shape index: {}]   ;;  %s2133_s7 = inlined_call_operand.hbm [shape: f32[2,8,1], index: 7, kind: input, shape index: {}]   ;;  %s2134_s8 = inlined_call_operand.hbm [shape: f32[2,4,8,8], index: 8, kind: output, shape index: {}]  }
   0x1   :  { %2164 = sst [smem:[#allocation42_spill]] %s2126_s0 }
   0x2   :  { %2165 = sst [smem:[#allocation43_spill]] %s2134_s8 }
   0x3   :  { %13 = vsyncpa [#allocation7], 0 }
   0x4   :  { %15 = vsyncpa [#allocation7 + $0x1], 0 }
   0x5   :  { %16 = vsyncpa [#allocation10], 0 }
   0x6   :  { %17 = vsyncpa [#allocation13], 0 }
   0x7   :  { %18 = vsyncpa [#allocation16], 0 }
   0x8   :  { %19 = vsyncpa [#allocation8], 0 }
   0x9   :  { %21 = vsyncpa [#allocation8 + $0x1], 0  ;;  %s1660_s27 = smov 0   ;;  %s1662_s28 = smov 0  }
   0xa   :  { %s1664_s29 = smov 0   ;;  %s1666_s30 = smov 0  }
   0xb   :  { %s1668_s9 = smov 0   ;;  %s1670_s10 = smov 0  }
   0xc   :  { %s1672_s11 = smov 0   ;;  %s1674_s12 = smov 0  }
   0xd   :  { %s1676_s13 = smov 0   ;;  %s1678_s14 = smov 0  }
   0xe   :  { %s1680_s15 = smov 0  }
   0xf LB: > { %2166 = sst [smem:[#allocation26_spill]] %s1546_s27  ;;  %s1714_s16 = sadd.s32 4294967295, %s1586_s15   ;;  %s1586_s15 = sphi %s1680_s15, %s27_s15   ;;  %s1582_s14 = sphi %s1678_s14, %s2230_s14   ;;  %s1578_s13 = sphi %s1676_s13, %s2227_s13   ;;  %s1574_s12 = sphi %s1674_s12, %s2229_s12   ;;  %s1570_s11 = sphi %s1672_s11, %s2226_s11   ;;  %s1566_s10 = sphi %s1670_s10, %s2225_s10   ;;  %s1562_s9 = sphi %s1668_s9, %s2224_s9   ;;  %s1558_s30 = sphi %s1666_s30, %s2223_s30   ;;  %s1554_s29 = sphi %s1664_s29, %s2222_s29   ;;  %s1550_s28 = sphi %s1662_s28, %s2221_s28   ;;  %s1546_s27 = sphi %s1660_s27, %s2220_s27  }
  0x10   : > { %2167 = sst [smem:[#allocation27_spill]] %s1550_s28  ;;  %s954_s17 = sadd.s32 4294967294, %s1586_s15  }
  0x11   : > { %2168 = sst [smem:[#allocation28_spill]] %s1554_s29  ;;  %s36_s18 = sadd.s32 1, %s1578_s13 }
  0x12   : > { %2169 = sst [smem:[#allocation29_spill]] %s1562_s9  ;;  %s39_s19 = sadd.s32 1, %s1582_s14 }
  0x13   : > { %2170 = sst [smem:[#allocation30_spill]] %s1566_s10  ;;  %p37_p0 = scmp.ge.s32.totalorder %s36_s18, 2 }
  0x14   : > { %2171 = sst [smem:[#allocation31_spill]] %s1570_s11  ;;  %s46_s20 = sadd.s32 1, %s1566_s10 }
  0x15   : > { %2172 = sst [smem:[#allocation32_spill]] %s1574_s12  ;;  %p53_p1 = scmp.ne.s32.totalorder %s1566_s10, %s1562_s9 }
  0x16   : > { %2173 = sst [smem:[#allocation33_spill]] %s1578_s13  ;;  %p54_p2 = scmp.eq.s32.totalorder %s1586_s15, 0 }
  0x17   : > { %2174 = sst [smem:[#allocation34_spill]] %s1586_s15  ;;  %s2232_s18 = smov (%p37_p0, %s36_s18), 0 }
  0x18   : > { %2175 = sst [smem:[#allocation35_spill]] %s2232_s18  ;;  %s2234_s19 = smov (!%p37_p0, %s39_s19), %s1582_s14 }
  0x19   : > { %p1726_p3 = por %p54_p2, %p53_p1  ;;  %p59_p4 = scmp.ne.s32.totalorder %s1562_s9, %s1558_s30 }
  0x1a   : > { %p41_p5 = scmp.ge.s32.totalorder %s2234_s19, 2  ;;  %p2141_p6 = scmp.eq.s32.totalorder %s1714_s16, 0 }
  0x1b   : > { %s227_s22 = ssub.s32 %s1578_s13, %s2232_s18  ;;  %s231_s23 = sadd.s32 1, %s1554_s29 }
  0x1c   : > { %s2236_s19 = smov (%p41_p5, %s2234_s19), 0  ;;  %p1739_p7 = por %p2141_p6, %p59_p4 }
  0x1d   : > { %2177 = sst [smem:[#allocation36_spill]] %s2236_s19  ;;  %p241_p8 = scmp.ne.s32.totalorder %s1554_s29, %s1550_s28 }
  0x1e   : > { %s2178_s24 = scalar_select %p1739_p7, 1, 0 }
  0x1f   : > { %s43_s25 = ssub.s32 %s1582_s14, %s2236_s19  ;;  %p242_p9 = scmp.eq.s32.totalorder %s1714_s16, 3 }
  0x20   : > { %2179 = sst [smem:[#allocation37_spill]] %s2178_s24  ;;  %p44_p10 = scmp.eq.s32.totalorder %s43_s25, 0 }
  0x21   : > { %s228_s26 = sor.u32 %s227_s22, %s43_s25  ;;  %p1748_p12 = por %p242_p9, %p241_p8 }
  0x22   : > { %p229_p11 = scmp.eq.s32.totalorder %s228_s26, 0  ;;  %p247_p13 = scmp.ne.s32.totalorder %s1550_s28, %s1546_s27 }
  0x23   : > { %s2180_s30 = scalar_select %p1748_p12, 1, 0 }
  0x24   : > { %s1753_s18 = scalar_select %p44_p10, %s1566_s10, %s46_s20  }
  0x25   : > { %2181 = sst [smem:[#allocation38_spill]] %s2180_s30  ;;  %p248_p0 = scmp.eq.s32.totalorder %s954_s17, 3 }
  0x26   : > { %2182 = sst [smem:[#allocation39_spill]] %s1753_s18  ;;  %p1096_p2 = scmp.lt.s32.totalorder %s1586_s15, 4 }
  0x27   : > { %s1756_s13 = scalar_select %p229_p11, %s1554_s29, %s231_s23  }
  0x28   : > { %p1760_p1 = por %p248_p0, %p247_p13  ;;  %s325_s19 = sand.u32 1, %s1586_s15  }
  0x29   : > { %2183 = sst [smem:[#allocation40_spill]] %s1756_s13  ;;  %s1767_s12 = sand.u32 1, %s1566_s10  }
  0x2a   : > { %s2184_s8 = scalar_select %p1760_p1, 1, 0 }
  0x2b   : > { %s962_s22 = sshll.u32 %s1767_s12, 2  ;;  %s963_s25 = sshll.u32 %s1582_s14, 6 }
  0x2c   : > { %2185 = sst [smem:[#allocation41_spill]] %s2184_s8  ;;  %s2186_s0 = sld [smem:[#allocation42_spill]] }
  0x2d   : > { %s329_s17 = scalar_lea.vmem [#allocation6], %s962_s22  ;;  %p1780_p4 = pnand %p1096_p2, %p1726_p3 }
  0x2e   : > { %s336_s23 = sshll.u32 %s329_s17, 4  ;;  %s1784_s10 = scalar_lea.sflag [#allocation7], %s325_s19  ;;  %s1776_s23 = int_to_ptr.vmem [resolvable:$true] %s336_s23 }
  0x2f   : > { %s2187_s18 = scalar_select %p1780_p4, 1, 0 }
  0x30   : > { %p1790_p8 = pneg %p1780_p4 }
  0x32   : > { %s1774_s20 = scalar_lea.hbm %s2186_s0, %s963_s25  ;;  %s1223_s25 = scalar_lea.hbm %s2186_s0, 128 }
  0x33   : > { %s1218_s13 = scalar_lea.hbm %s1774_s20, 64  ;;  %p1224_p3 = scmp.lt.u32.totalorder %s1774_s20, %s2186_s0 }
  0x34   : > { %p1219_p5 = scmp.ne.s32.totalorder %s1774_s20, %s1218_s13  ;;  %p1225_p11 = scmp.lt.u32.totalorder %s1223_s25, %s1218_s13 }
  0x35   : > { %s2188_s11 = scalar_select %p1790_p8, 1, 0 }
  0x36   : > { %p1221_p9 = pnand %p1790_p8, %p1219_p5  ;;  %p1226_p13 = por %p1225_p11, %p1224_p3 }
  0x37   : > { %p1227_p0 = scmp.lt.u32.totalorder %s1218_s13, %s1774_s20 }
  0x38   : > { %p1222_p10 = pneg %p1221_p9 }
  0x39   : > { %p1228_p2 = por %p1227_p0, %p1226_p13 }
  0x3b   : > { %p1229_p6 = pnand %p1228_p2, %p1222_p10 }
  0x3d   : > { %1232 = shalt.err (!%p1229_p6)
}
  0x3e   : > { %s1233_s19 = scalar_lea.vmem %s1776_s23, 64  ;;  %s1588_s22 = smov [#allocation6]  }
  0x3f   : > { %p1234_p5 = scmp.ne.s32.totalorder %s1776_s23, %s1233_s19  ;;  %s1238_s21 = sshll.u32 %s1588_s22, 4  ;;  %s1239_s21 = int_to_ptr.vmem [resolvable:$false] %s1238_s21 }
  0x40   : > { %s1240_s26 = scalar_lea.vmem %s1239_s21, 128  ;;  %p1241_p12 = scmp.lt.s32.totalorder %s1776_s23, %s1239_s21 }
  0x41   : > { %p1236_p9 = pnand %p1234_p5, %p1790_p8  ;;  %p1242_p7 = scmp.lt.s32.totalorder %s1240_s26, %s1233_s19 }
  0x43   : > { %p1237_p1 = pneg %p1236_p9  ;;  %p1243_p3 = por %p1242_p7, %p1241_p12 }
  0x45   : > { %p1244_p11 = pnand %p1243_p3, %p1237_p1 }
  0x47   : > { %1247 = shalt.err (!%p1244_p11)
}
  0x48   : > { %1080 = dma.hbm_to_vmem [thread:$0]  (!%p1780_p4), %s1774_s20, 64, %s1776_s23, %s1784_s10  }
  0x49   : > { %p955_p6 = scmp.ge.s32.totalorder %s1586_s15, 1  ;;  %p255_p10 = scmp.lt.s32.totalorder %s1586_s15, 5 }
  0x4a   : > { %s1589_s13 = smov [#allocation9]   ;;  %s1590_s19 = smov [#allocation12]  }
  0x4b   : > { %s267_s25 = sshll.u32 %s1589_s13, 4  ;;  %p1816_p13 = pnand %p955_p6, %p255_p10  ;;  %s1820_s25 = int_to_ptr.vmem [resolvable:$true] %s267_s25 }
  0x4c   : > { %s292_s22 = sshll.u32 %s1590_s19, 4  ;;  %p2190_p12 = scmp.eq.s32.totalorder %s1714_s16, 0  ;;  %s1824_s22 = int_to_ptr.vmem [resolvable:$true] %s292_s22 }
  0x4d   : > { %s2189_s17 = scalar_select %p1816_p13, 1, 0 }
  0x4e   : > { %p1061_p7 = pneg %p1816_p13  ;;  %s964_s23 = sshll.u32 %s1582_s14, 4 }
  0x4f   : > { %s1836_s13 = scalar_lea.hbm %s2132_s6, %s964_s23  ;;  %s346_s0 = scalar_lea.vmem [#allocation17], %s1767_s12 }
  0x50   : > { %p1828_p1 = pnand %p1061_p7, %p2190_p12  ;;  %s353_s29 = sshll.u32 %s346_s0, 4  ;;  %s1839_s29 = int_to_ptr.vmem [resolvable:$true] %s353_s29 }
  0x51   : > { %s1248_s27 = scalar_lea.hbm %s2127_s1, 256 }
  0x52   : > { %s2191_s20 = scalar_select %p1828_p1, 1, 0 }
  0x53   : > { %p1249_p0 = scmp.ne.s32.totalorder %s2127_s1, %s1248_s27  ;;  %p1849_p2 = pneg %p1828_p1 }
  0x54   : > { %p1255_p3 = scmp.lt.u32.totalorder %s1248_s27, %s2127_s1 }
  0x55   : > { %s2192_s28 = scalar_select %p1849_p2, 1, 0 }
  0x56   : > { %p1251_p5 = pnand %p1849_p2, %p1249_p0 }
  0x58   : > { %p1252_p9 = pneg %p1251_p5 }
  0x5a   : > { %p1257_p11 = pnand %p1255_p3, %p1252_p9 }
  0x5c   : > { %1260 = shalt.err (!%p1257_p11)
}
  0x5d   : > { %s1261_s8 = scalar_lea.vmem %s1820_s25, 256  ;;  %p1269_p12 = scmp.lt.s32.totalorder %s1820_s25, %s1820_s25 }
  0x5e   : > { %p1262_p6 = scmp.ne.s32.totalorder %s1820_s25, %s1261_s8  ;;  %p1270_p13 = scmp.lt.s32.totalorder %s1261_s8, %s1261_s8 }
  0x60   : > { %p1264_p10 = pnand %p1262_p6, %p1849_p2  ;;  %p1271_p0 = por %p1270_p13, %p1269_p12 }
  0x62   : > { %p1265_p7 = pneg %p1264_p10 }
  0x64   : > { %p1272_p5 = pnand %p1271_p0, %p1265_p7 }
  0x66   : > { %1275 = shalt.err (!%p1272_p5)
}
  0x67   : > { %s1591_s15 = smov 64   ;;  %s1592_s27 = smov 4  }
  0x68   : > { %1064 = dma.hbm_to_vmem [thread:$0]  (!%p1828_p1), %s2127_s1, 256, %s1820_s25, [#allocation10], %s1591_s15, %s1591_s15, %s1592_s27  }
  0x69   : > { %s1276_s0 = scalar_lea.hbm %s2129_s3, 128 }
  0x6a   : > { %p1277_p13 = scmp.ne.s32.totalorder %s2129_s3, %s1276_s0  ;;  %p1283_p11 = scmp.lt.u32.totalorder %s1276_s0, %s2129_s3 }
  0x6c   : > { %p1279_p9 = pnand %p1277_p13, %p1849_p2 }
  0x6e   : > { %p1280_p3 = pneg %p1279_p9 }
  0x70   : > { %p1285_p6 = pnand %p1283_p11, %p1280_p3 }
  0x72   : > { %1288 = shalt.err (!%p1285_p6)
}
  0x73   : > { %s1289_s25 = scalar_lea.vmem %s1824_s22, 128  ;;  %p1297_p0 = scmp.lt.s32.totalorder %s1824_s22, %s1824_s22 }
  0x74   : > { %p1290_p10 = scmp.ne.s32.totalorder %s1824_s22, %s1289_s25  ;;  %p1298_p5 = scmp.lt.s32.totalorder %s1289_s25, %s1289_s25 }
  0x76   : > { %p1292_p7 = pnand %p1290_p10, %p1849_p2  ;;  %p1299_p13 = por %p1298_p5, %p1297_p0 }
  0x78   : > { %p1293_p12 = pneg %p1292_p7 }
  0x7a   : > { %p1300_p9 = pnand %p1299_p13, %p1293_p12 }
  0x7c   : > { %1303 = shalt.err (!%p1300_p9)
}
  0x7d   : > { %1070 = dma.hbm_to_vmem [thread:$0]  (!%p1828_p1), %s2129_s3, 128, %s1824_s22, [#allocation13]  }
  0x7e   : > { %s1304_s15 = scalar_lea.hbm %s1836_s13, 16  ;;  %s1309_s21 = scalar_lea.hbm %s2132_s6, 32 }
  0x7f   : > { %p1305_p3 = scmp.ne.s32.totalorder %s1836_s13, %s1304_s15  ;;  %p1310_p10 = scmp.lt.u32.totalorder %s1836_s13, %s2132_s6 }
  0x80   : > { %p1311_p7 = scmp.lt.u32.totalorder %s1309_s21, %s1304_s15  ;;  %p1313_p0 = scmp.lt.u32.totalorder %s1304_s15, %s1836_s13 }
  0x81   : > { %p1307_p11 = pnand %p1305_p3, %p1790_p8 }
  0x82   : > { %p1312_p12 = por %p1311_p7, %p1310_p10 }
  0x83   : > { %p1308_p6 = pneg %p1307_p11 }
  0x84   : > { %p1314_p5 = por %p1313_p0, %p1312_p12 }
  0x86   : > { %p1315_p13 = pnand %p1314_p5, %p1308_p6 }
  0x88   : > { %1318 = shalt.err (!%p1315_p13)
}
  0x89   : > { %s1319_s22 = scalar_lea.vmem %s1839_s29, 16  ;;  %s1593_s0 = smov [#allocation17]  }
  0x8a   : > { %p1320_p9 = scmp.ne.s32.totalorder %s1839_s29, %s1319_s22  ;;  %s1324_s23 = sshll.u32 %s1593_s0, 4  ;;  %s1325_s23 = int_to_ptr.vmem [resolvable:$false] %s1324_s23 }
  0x8b   : > { %s1326_s8 = scalar_lea.vmem %s1325_s23, 32  ;;  %p1327_p1 = scmp.lt.s32.totalorder %s1839_s29, %s1325_s23 }
  0x8c   : > { %p1322_p3 = pnand %p1320_p9, %p1790_p8  ;;  %p1328_p2 = scmp.lt.s32.totalorder %s1326_s8, %s1319_s22 }
  0x8e   : > { %p1323_p11 = pneg %p1322_p3  ;;  %p1329_p10 = por %p1328_p2, %p1327_p1 }
  0x90   : > { %p1330_p7 = pnand %p1329_p10, %p1323_p11 }
  0x92   : > { %1333 = shalt.err (!%p1330_p7)
}
  0x93   : > { %1083 = dma.hbm_to_vmem [thread:$0]  (!%p1780_p4), %s1836_s13, 16, %s1839_s29, %s1784_s10  }
  0x94   : > { %s1594_s25 = smov [#allocation11]   ;;  %s1595_s24 = smov [#allocation14]  }
  0x95   : > { %s281_s9 = sshll.u32 %s1594_s25, 4  ;;  %s303_s15 = sshll.u32 %s1595_s24, 4  ;;  %s282_s9 = int_to_ptr.vmem [resolvable:$true] %s281_s9  ;;  %s1915_s15 = int_to_ptr.vmem [resolvable:$true] %s303_s15 }
  0x96   : > { %s1334_s21 = scalar_lea.hbm %s2128_s2, 16  ;;  %p2193_p2 = scmp.ne.s32.totalorder %s2192_s28, 0 }
  0x97   : > { %p1335_p1 = scmp.ne.s32.totalorder %s2128_s2, %s1334_s21  ;;  %p1341_p0 = scmp.lt.u32.totalorder %s1334_s21, %s2128_s2 }
  0x99   : > { %p1337_p6 = pnand %p1335_p1, %p2193_p2 }
  0x9b   : > { %p1338_p12 = pneg %p1337_p6 }
  0x9d   : > { %p1343_p5 = pnand %p1341_p0, %p1338_p12 }
  0x9f   : > { %1346 = shalt.err (!%p1343_p5)
}
  0xa0   : > { %s1347_s13 = scalar_lea.vmem %s282_s9, 16  ;;  %s1354_s0 = scalar_lea.vmem %s282_s9, 32 }
  0xa1   : > { %p1348_p13 = scmp.ne.s32.totalorder %s282_s9, %s1347_s13  ;;  %p1355_p11 = scmp.lt.s32.totalorder %s282_s9, %s282_s9 }
  0xa2   : > { %p1356_p10 = scmp.lt.s32.totalorder %s1354_s0, %s1347_s13 }
  0xa3   : > { %p1350_p9 = pnand %p1348_p13, %p2193_p2 }
  0xa4   : > { %p1357_p7 = por %p1356_p10, %p1355_p11 }
  0xa5   : > { %p1351_p3 = pneg %p1350_p9 }
  0xa7   : > { %p1358_p4 = pnand %p1357_p7, %p1351_p3 }
  0xa9   : > { %1361 = shalt.err (!%p1358_p4)
}
  0xaa   : > { %p2194_p1 = scmp.ne.s32.totalorder %s2191_s20, 0  ;;  %s1362_s27 = scalar_lea.hbm %s2130_s4, 128 }
  0xab   : > { %p1363_p6 = scmp.ne.s32.totalorder %s2130_s4, %s1362_s27  ;;  %p1369_p4 = scmp.lt.u32.totalorder %s1362_s27, %s2130_s4 }
  0xac   : > { %1067 = dma.hbm_to_vmem [thread:$0]  (!%p2194_p1), %s2128_s2, 16, %s282_s9, [#allocation10]  }
  0xad   : > { %p1365_p12 = pnand %p1363_p6, %p2193_p2 }
  0xaf   : > { %p1366_p0 = pneg %p1365_p12 }
  0xb1   : > { %p1371_p5 = pnand %p1369_p4, %p1366_p0 }
  0xb3   : > { %1374 = shalt.err (!%p1371_p5)
}
  0xb4   : > { %s1375_s9 = scalar_lea.vmem %s1915_s15, 128  ;;  %p1383_p11 = scmp.lt.s32.totalorder %s1915_s15, %s1915_s15 }
  0xb5   : > { %p1376_p13 = scmp.ne.s32.totalorder %s1915_s15, %s1375_s9  ;;  %p1384_p10 = scmp.lt.s32.totalorder %s1375_s9, %s1375_s9 }
  0xb7   : > { %p1378_p9 = pnand %p1376_p13, %p2193_p2  ;;  %p1385_p7 = por %p1384_p10, %p1383_p11 }
  0xb9   : > { %p1379_p3 = pneg %p1378_p9 }
  0xbb   : > { %p1386_p6 = pnand %p1385_p7, %p1379_p3 }
  0xbd   : > { %1389 = shalt.err (!%p1386_p6)
}
  0xbe   : > { %1073 = dma.hbm_to_vmem [thread:$0]  (!%p2194_p1), %s2130_s4, 128, %s1915_s15, [#allocation13]  }
  0xbf   : > { %s965_s13 = sshll.u32 %s1767_s12, 3  ;;  %s1596_s0 = smov [#allocation15]  }
  0xc0   : > { %s314_s23 = sshll.u32 %s1596_s0, 4  ;;  %s966_s8 = sshll.u32 %s1582_s14, 7  ;;  %s315_s23 = int_to_ptr.vmem [resolvable:$true] %s314_s23 }
  0xc1   : > { %s1390_s27 = scalar_lea.hbm %s2131_s5, 128 }
  0xc2   : > { %p1391_p12 = scmp.ne.s32.totalorder %s2131_s5, %s1390_s27  ;;  %p1397_p5 = scmp.lt.u32.totalorder %s1390_s27, %s2131_s5 }
  0xc4   : > { %p1393_p0 = pnand %p1391_p12, %p2193_p2 }
  0xc6   : > { %p1394_p4 = pneg %p1393_p0 }
  0xc8   : > { %p1399_p13 = pnand %p1397_p5, %p1394_p4 }
  0xca   : > { %1402 = shalt.err (!%p1399_p13)
}
  0xcb   : > { %s1403_s12 = scalar_lea.vmem %s315_s23, 128  ;;  %p1411_p10 = scmp.lt.s32.totalorder %s315_s23, %s315_s23 }
  0xcc   : > { %p1404_p9 = scmp.ne.s32.totalorder %s315_s23, %s1403_s12  ;;  %p1412_p7 = scmp.lt.s32.totalorder %s1403_s12, %s1403_s12 }
  0xce   : > { %p1406_p3 = pnand %p1404_p9, %p2193_p2  ;;  %p1413_p6 = por %p1412_p7, %p1411_p10 }
  0xd0   : > { %p1407_p11 = pneg %p1406_p3 }
  0xd2   : > { %p1414_p8 = pnand %p1413_p6, %p1407_p11 }
  0xd4   : > { %1417 = shalt.err (!%p1414_p8)
}
  0xd5   : > { %1076 = dma.hbm_to_vmem [thread:$0]  (!%p2194_p1), %s2131_s5, 128, %s315_s23, [#allocation16]  }
  0xd6   : > { %s1981_s0 = scalar_lea.hbm %s2133_s7, %s966_s8  ;;  %s364_s28 = scalar_lea.vmem [#allocation18], %s965_s13 }
  0xd7   : > { %s371_s25 = sshll.u32 %s364_s28, 4  ;;  %s1418_s24 = scalar_lea.hbm %s1981_s0, 128  ;;  %s372_s25 = int_to_ptr.vmem [resolvable:$true] %s371_s25 }
  0xd8   : > { %p1419_p8 = scmp.ne.s32.totalorder %s1981_s0, %s1418_s24  ;;  %p2195_p2 = scmp.ne.s32.totalorder %s2188_s11, 0 }
  0xd9   : > { %s1423_s23 = scalar_lea.hbm %s2133_s7, 256  ;;  %p1424_p1 = scmp.lt.u32.totalorder %s1981_s0, %s2133_s7 }
  0xda   : > { %p1421_p12 = pnand %p1419_p8, %p2195_p2  ;;  %p1425_p4 = scmp.lt.u32.totalorder %s1423_s23, %s1418_s24 }
  0xdb   : > { %p1427_p13 = scmp.lt.u32.totalorder %s1418_s24, %s1981_s0 }
  0xdc   : > { %p1422_p0 = pneg %p1421_p12  ;;  %p1426_p5 = por %p1425_p4, %p1424_p1 }
  0xde   : > { %p1428_p9 = por %p1427_p13, %p1426_p5 }
  0xe0   : > { %p1429_p3 = pnand %p1428_p9, %p1422_p0 }
  0xe2   : > { %1432 = shalt.err (!%p1429_p3)
}
  0xe3   : > { %s1433_s13 = scalar_lea.vmem %s372_s25, 128  ;;  %s1597_s8 = smov [#allocation18]  }
  0xe4   : > { %p1434_p11 = scmp.ne.s32.totalorder %s372_s25, %s1433_s13  ;;  %s1438_s26 = sshll.u32 %s1597_s8, 4  ;;  %s1439_s26 = int_to_ptr.vmem [resolvable:$false] %s1438_s26 }
  0xe5   : > { %s1440_s19 = scalar_lea.vmem %s1439_s26, 256  ;;  %p1441_p6 = scmp.lt.s32.totalorder %s372_s25, %s1439_s26 }
  0xe6   : > { %p1436_p10 = pnand %p1434_p11, %p2195_p2  ;;  %p1442_p8 = scmp.lt.s32.totalorder %s1440_s19, %s1433_s13 }
  0xe8   : > { %p1437_p7 = pneg %p1436_p10  ;;  %p1443_p12 = por %p1442_p8, %p1441_p6 }
  0xea   : > { %p1444_p1 = pnand %p1443_p12, %p1437_p7 }
  0xec   : > { %1447 = shalt.err (!%p1444_p1)
}
  0xed   : > { %p2196_p4 = scmp.ne.s32.totalorder %s2187_s18, 0  ;;  %p2197_p0 = scmp.ne.s32.totalorder %s2189_s17, 0 }
  0xee   : > { %s2198_s11 = sld [smem:[#allocation29_spill]] (!%p2197_p0)  ;;  %s2199_s12 = sld [smem:[#allocation37_spill]] (!%p2197_p0) }
  0xef   : > { %1086 = dma.hbm_to_vmem [thread:$0]  (!%p2196_p4), %s1981_s0, 128, %s372_s25, %s1784_s10  }
  0xf0   : > { %380 = sbr.rel (%p2197_p0) target bundleno = 992 (0x3e0), region = 52  ;;  %s382_s15 = sand.u32 (!%p2197_p0), 1, %s1714_s16  }
  0xf1   : > { %s383_s29 = scalar_lea.sflag (!%p2197_p0), [#allocation7], %s382_s15 }
  0xf4   : > { %s2005_s9 = sand.u32 (!%p2197_p0), 1, %s2198_s11   ;;  %p2200_p2 = scmp.ne.s32.totalorder (!%p2197_p0), %s2199_s12, 0 }
  0xf5   : > { %s968_s22 = sshll.u32 (!%p2197_p0), %s2005_s9, 2 }
  0xf6   : > { %s386_s28 = scalar_lea.vmem (!%p2197_p0), [#allocation6], %s968_s22 }
  0xf7   : > { %1521 = dma.done.wait (%p2200_p2), %s383_s29, 64  }
  0xf8   : > { %1523 = vsyncadd (%p2200_p2), %s383_s29, 4294967232  ;;  %p2201_p5 = scmp.eq.s32.totalorder %s1714_s16, 0 }
  0xfa   : > { %1525 = dma.done.wait (%p2201_p5), [#allocation10], 272   ;;  %p2202_p13 = pmov %p2201_p5 }
  0xfb   : > { %p2203_p9 = pmov %p2201_p5 }
  0xfc   : > { %1527 = vsyncadd (%p2202_p13), [#allocation10], 4294967024 }
  0xfd   : > { %1529 = dma.done.wait (%p2203_p9), [#allocation13], 256   ;;  %p2204_p3 = pmov %p2201_p5 }
  0xff   : > { %1531 = vsyncadd (%p2204_p3), [#allocation13], 4294967040  ;;  %p2205_p11 = pmov %p2204_p3 }
 0x100   : > { %p2206_p10 = pmov %p2204_p3 }
 0x101   : > { %1533 = dma.done.wait (%p2205_p11), [#allocation16], 128  }
 0x102   : > { %1535 = vsyncadd (%p2206_p10), [#allocation16], 4294967168  ;;  %s414_s10 = scalar_lea.vmem [#allocation17], %s2005_s9 }
 0x103   : > { %1537 = dma.done.wait (%p2200_p2), %s383_s29, 144  }
 0x104   : > { %1539 = vsyncadd (%p2200_p2), %s383_s29, 4294967152  ;;  %s2207_s18 = sld [smem:[#allocation27_spill]]  ;;  %s974_s17 = sshll.u32 %s2005_s9, 3 }
 0x105   : > { %s423_s24 = scalar_lea.vmem [#allocation18], %s974_s17  ;;  %s2208_s16 = sld [smem:[#allocation31_spill]] }
 0x10a   : > { %s462_s0 = sand.u32 1, %s2207_s18  }
 0x10b   : > { %s975_s25 = sshll.u32 %s462_s0, 4  ;;  %p976_p7 = scmp.ne.s32.totalorder %s2208_s16, 0 }
 0x10c   : > { %s2033_s20 = scalar_lea.vmem [#allocation19], %s975_s25  ;;  %v1216_v0 = vld [vmem:[#allocation9] sm:$0xff] (!%p976_p7)   ;;  %v1598_v1 = vmov (!%p976_p7), 0.0   ;;  %v1217_v2 = vld [vmem:[#allocation9 + $0x8] sm:$0xff] (!%p976_p7)   ;;  %vm1599_vm0 = vmmov (!%p976_p7), 0   ;;  %vm495_vm1 = vcmask (!%p976_p7), 261120   ;;  %v593_v15 = vlaneseq (!%p976_p7) }
 0x10d   : > { %470 = sbr.rel (%p976_p7) target bundleno = 744 (0x2e8), region = 88  ;;  %1013 = vmatprep.subr.bf16.mxu0 (!%p976_p7), %v1598_v1  ;;  %1017 = vmatprep.mubr.msk.bf16.mxu0 (!%p976_p7), %vm1599_vm0, %v1598_v1  ;;  %v471_v3 = vld [vmem:[%s386_s28] sm:$0xf] (!%p976_p7)  ;;  %v591_v4 = vld [vmem:[%s423_s24] sm:$0xff] (!%p976_p7)  ;;  %v1600_v5 = vmov (!%p976_p7), 0   ;;  %s1601_s27 = smov (!%p976_p7), 127  }
 0x10e   : > { %1014 = vmatpush3.bf16.msra.mxu0 (!%p976_p7), %v1216_v0  ;;  %1214 = vset.pattern.permute.xlu1 (!%p976_p7), %v1600_v5  ;;  %v615_v6 = vsub.f32 (!%p976_p7), 1.0, %v591_v4  ;;  %v977_v8 = vld [vmem:[#allocation11] ss:$0 sm:$0xff] (!%p976_p7)  ;;  %s1602_s23 = smov (!%p976_p7), 1   ;;  %v592_v14 = vld [vmem:[%s414_s10] sm:$0x1] (!%p976_p7) }
 0x10f   : > { %1015 = vmatprep.subr.bf16.mxu0 (!%p976_p7), %v1598_v1  ;;  %1215 = vset.pattern.permute.xlu0 (!%p976_p7), %v1600_v5  ;;  %v623_v17 = vsub.f32 (!%p976_p7), 1.0, %v592_v14  ;;  %v594_v18 = vshrl.u32 (!%p976_p7), %v593_v15, 7  ;;  %v596_v19 = vand.u32 (!%p976_p7), 127, %v593_v15  ;;  %vm613_vm3 = vcmask (!%p976_p7), 64512   ;;  %v543_v33 = vld [vmem:[#allocation14] sm:$0xff] (!%p976_p7)  ;;  %v539_v34 = vld [vmem:[#allocation12] sm:$0xff] (!%p976_p7) }
 0x110   : > { %v616_v7 = vmul.f32 (!%p976_p7), -1e+12, %v615_v6  ;;  %v548_v37 = vld [vmem:[#allocation15] sm:$0xff] (!%p976_p7)  ;;  %vm552_vm4 = vcmask (!%p976_p7), 125952   ;;  %s1603_s30 = smov (!%p976_p7), 96   ;;  %s1604_s21 = smov (!%p976_p7), 112  }
 0x111   : > { %v624_v20 = vmul.f32 (!%p976_p7), -1e+12, %v623_v17  ;;  %vm597_vm2 = vcmp.gt.s32.totalorder (!%p976_p7), %v594_v18, %v596_v19  ;;  %v608_v21 = vsub.s32 (!%p976_p7), 0, %v594_v18  ;;  %s1605_s13 = smov (!%p976_p7), 64   ;;  %s1606_s8 = smov (!%p976_p7), 80  }
 0x112   : > { %1016 = vmatpush3.bf16.msra.mxu0 (!%p976_p7), %v1217_v2  ;;  %619 = vperm.xlu1 (!%p976_p7), %1214, %v616_v7   ;;  %v982_v22 = vsel (!%p976_p7), %vm597_vm2, 1.0, %v1598_v1  ;;  %s1607_s26 = smov (!%p976_p7), 32   ;;  %s1608_s19 = smov (!%p976_p7), 48  }
 0x113   : > { %v609_v24 = vrot.slane (!%p976_p7), %v592_v14, %v608_v21  ;;  %v629_v25 = vrot.slane (!%p976_p7), %v624_v20, %v608_v21  ;;  %v632_v27 = vmul.f32 (!%p976_p7), 1e+12, %v982_v22  ;;  %s1609_s11 = smov (!%p976_p7), 16  }
 0x115   : > { %1018 = vmatmul.mubr.msk.bf16.vlgmr.msra.gmra.mrb[0].mxu0 %vm495_vm1, %v471_v3 }
 0x116   : > { %602 = vperm.xlu1 %1214, %v591_v4  }
 0x191   : > { %v620_v16 = vpop.permute.xlu1 %619 }
 0x192   : > { %v622_v26 = vmul.f32 %v620_v16, %v609_v24 }
 0x194   : > { %v631_v29 = vadd.f32 %v629_v25, %v622_v26 }
 0x195   : > { %v603_v23 = vpop.permute.xlu1 %602 }
 0x196   : > { %v611_v28 = vmul.f32 %v609_v24, %v603_v23  ;;  %v633_v31 = vsub.f32 %v631_v29, %v632_v27 }
 0x198   : > { %v612_v30 = vmul.f32 0.25, %v611_v28  ;;  %v634_v32 = vmul.f32 0.25, %v633_v31 }
 0x19a   : > { %614 = vst.msk [vmem:[#allocation4] sm:$0xff] %vm613_vm3, %v612_v30  ;;  %635 = vst.msk [vmem:[#allocation5] sm:$0xff] %vm613_vm3, %v634_v32 }
 0x1e8   : > { %v533_v9 = vpop.f32.mrb[0].mxu0 }
 0x1e9   : > { %v534_v10 = vadd.f32 %v977_v8, %v533_v9  ;;  %v1019_v11 = vpop.f32.mrb[1].mxu0 }
 0x1ea   : > { %v536_v12 = vpop.f32.mrb[2].mxu0 }
 0x1eb   : > { %541 = vrot.lane.b32.xlu0 %v534_v10, %s1601_s27  ;;  %v1020_v13 = vpop.f32.mrb[3].mxu0  ;;  %v540_v38 = vmul.f32 %v539_v34, %v534_v10 }
 0x1ef   : > { %546 = vrot.lane.b32.xlu0 %v534_v10, %s1602_s23 }
 0x25d   : > { %v542_v35 = vpop.permute.xlu0 %541 }
 0x25e   : > { %v544_v36 = vmul.f32 %v543_v33, %v542_v35 }
 0x260   : > { %v545_v40 = vadd.f32 %v544_v36, %v540_v38 }
 0x261   : > { %v547_v39 = vpop.permute.xlu0 %546 }
 0x262   : > { %v549_v41 = vmul.f32 %v548_v37, %v547_v39 }
 0x264   : > { %v550_v42 = vadd.f32 %v549_v41, %v545_v40 }
 0x266   : > { %v551_v43 = vpack.c.bf16 %v550_v42, %v550_v42 }
 0x268   : > { %561 = vrot.lane.b32.xlu1 %v551_v43, %s1603_s30  ;;  %557 = vrot.lane.b32.xlu0 %v551_v43, %s1604_s21  ;;  %553 = vst.msk [vmem:[#allocation2] sm:$0xf] %vm552_vm4, %v551_v43 }
 0x26c   : > { %571 = vrot.lane.b32.xlu1 %v551_v43, %s1605_s13  ;;  %566 = vrot.lane.b32.xlu0 %v551_v43, %s1606_s8 }
 0x270   : > { %581 = vrot.lane.b32.xlu1 %v551_v43, %s1607_s26  ;;  %576 = vrot.lane.b32.xlu0 %v551_v43, %s1608_s19 }
 0x274   : > { %586 = vrot.lane.b32.xlu0 %v551_v43, %s1609_s11 }
 0x2da   : > { %v562_v44 = vpop.permute.xlu1 %561  ;;  %v558_v45 = vpop.permute.xlu0 %557 }
 0x2db   : > { %565 = vst.msk [vmem:[#allocation2 + $0x4] sm:$0xf] %vm552_vm4, %v562_v44  ;;  %560 = vst.msk [vmem:[#allocation3] sm:$0xf] %vm552_vm4, %v558_v45 }
 0x2de   : > { %v572_v46 = vpop.permute.xlu1 %571  ;;  %v567_v47 = vpop.permute.xlu0 %566 }
 0x2df   : > { %575 = vst.msk [vmem:[#allocation2 + $0x8] sm:$0xf] %vm552_vm4, %v572_v46  ;;  %570 = vst.msk [vmem:[#allocation3 + $0x4] sm:$0xf] %vm552_vm4, %v567_v47 }
 0x2e2   : > { %v582_v48 = vpop.permute.xlu1 %581  ;;  %v577_v49 = vpop.permute.xlu0 %576 }
 0x2e3   : > { %585 = vst.msk [vmem:[#allocation2 + $0xc] sm:$0xf] %vm552_vm4, %v582_v48  ;;  %580 = vst.msk [vmem:[#allocation3 + $0x8] sm:$0xf] %vm552_vm4, %v577_v49 }
 0x2e6   : > { %v587_v50 = vpop.permute.xlu0 %586 }
 0x2e7   : > { %590 = vst.msk [vmem:[#allocation3 + $0xc] sm:$0xf] %vm552_vm4, %v587_v50 }
 0x2e8 PF: > { %s2209_s12 = sld [smem:[#allocation31_spill]]  ;;  %vm645_vm5 = vcmask 130048   ;;  %v1610_v51 = vmov 0.0   ;;  %s2210_s22 = sld [smem:[#allocation32_spill]]  ;;  %vm1611_vm6 = vmmov 0   ;;  %v636_v58 = vld [vmem:[#allocation4] sm:$0xff] }
 0x2e9   : > { %1021 = vmatprep.subr.bf16.mxu0 %v1610_v51  ;;  %1027 = vmatprep.subr.bf16.mxu1 %v1610_v51  ;;  %s769_s25 = sshll.u32 %s2033_s20, 4  ;;  %v637_v59 = vld [vmem:[#allocation5] sm:$0xff]  ;;  %s2212_s16 = sld [smem:[#allocation38_spill]]  ;;  %vm694_vm7 = vcmask 64512   ;;  %s2059_s25 = int_to_ptr.vmem [resolvable:$true] %s769_s25 }
 0x2ea   : > { %1023 = vmatprep.mubr.msk.bf16.mxu0 %vm1611_vm6, %v1610_v51  ;;  %1029 = vmatprep.mubr.msk.bf16.mxu1 %vm1611_vm6, %v1610_v51  ;;  %s2213_s30 = sld [smem:[#allocation43_spill]]  ;;  %s2065_s8 = scalar_lea.sflag [#allocation8], %s462_s0 }
 0x2eb   : > { %s1448_s26 = scalar_lea.vmem %s2059_s25, 256  ;;  %s1612_s19 = smov [#allocation19]  }
 0x2ec   : > { %p1449_p6 = scmp.ne.s32.totalorder %s2059_s25, %s1448_s26  ;;  %s1452_s11 = sshll.u32 %s1612_s19, 4  ;;  %s1453_s11 = int_to_ptr.vmem [resolvable:$false] %s1452_s11 }
 0x2ed   : > { %p1455_p4 = scmp.lt.s32.totalorder %s2059_s25, %s1453_s11 }
 0x2ee   : > { %s1002_s15 = sshll.u32 %s2209_s12, 3  ;;  %s996_s28 = sshll.u32 %s2209_s12, 1 }
 0x2ef   : > { %s643_s9 = scalar_lea.vmem [#allocation3], %s1002_s15  ;;  %s640_s29 = scalar_lea.vmem [#allocation2], %s1002_s15 }
 0x2f0   : > { %v644_v52 = vld [vmem:[%s643_s9] sm:$0xf]  ;;  %v992_v53 = vld [vmem:[%s643_s9 + $0x4] sm:$0xf]  ;;  %s997_s10 = sshll.u32 %s2210_s22, 2  ;;  %s2214_s21 = smov %s2213_s30 }
 0x2f1   : > { %v650_v54 = vsel %vm645_vm5, %v644_v52, 0  ;;  %v707_v55 = vsel %vm645_vm5, %v992_v53, 0  ;;  %v641_v56 = vld [vmem:[%s640_s29] sm:$0xf]  ;;  %v989_v57 = vld [vmem:[%s640_s29 + $0x4] sm:$0xf]  ;;  %s766_s18 = sadd.s32 %s997_s10, %s996_s28 }
 0x2f2   : > { %1022 = vmatpush3.bf16.xpose.msra.mxu0 %v650_v54  ;;  %1028 = vmatpush3.bf16.xpose.msra.mxu1 %v707_v55  ;;  %s998_s17 = sshll.u32 %s766_s18, 7  ;;  %p2215_p8 = scmp.ne.s32.totalorder %s2212_s16, 0 }
 0x2f3   : > { %s2057_s13 = scalar_lea.hbm %s2213_s30, %s998_s17  ;;  %s1454_s12 = scalar_lea.vmem %s1453_s11, 512 }
 0x2f4   : > { %p1450_p12 = pnand %p1449_p6, %p2215_p8  ;;  %p1456_p0 = scmp.lt.s32.totalorder %s1454_s12, %s1448_s26 }
 0x2f6   : > { %p1451_p1 = pneg %p1450_p12  ;;  %p1457_p2 = por %p1456_p0, %p1455_p4 }
 0x2f8   : > { %p1458_p5 = pnand %p1457_p2, %p1451_p1 }
 0x2f9   : > { %1024 = vmatmul.mubr.msk.bf16.vlgmr.msra.gmra.mrb[0].mxu0 %vm645_vm5, %v641_v56  ;;  %1030 = vmatmul.mubr.msk.bf16.vlgmr.msra.gmra.mrb[0].mxu1 %vm645_vm5, %v989_v57 }
 0x3cc   : > { %v686_v60 = vpop.f32.mrb[0].mxu0  ;;  %v743_v61 = vpop.f32.mrb[0].mxu1 }
 0x3cd   : > { %v692_v62 = vmul.f32 %v686_v60, %v636_v58  ;;  %v749_v63 = vmul.f32 %v743_v61, %v636_v58  ;;  %v1025_v0 = vpop.f32.mrb[1].mxu0  ;;  %v1031_v1 = vpop.f32.mrb[1].mxu1 }
 0x3ce   : > { %v689_v2 = vpop.f32.mrb[2].mxu0  ;;  %v746_v3 = vpop.f32.mrb[2].mxu1 }
 0x3cf   : > { %v693_v4 = vadd.f32 %v692_v62, %v637_v59  ;;  %v750_v5 = vadd.f32 %v749_v63, %v637_v59  ;;  %v1026_v6 = vpop.f32.mrb[3].mxu0  ;;  %v1032_v7 = vpop.f32.mrb[3].mxu1 }
 0x3d1   : > { %695 = vst.msk [vmem:[%s2033_s20] sm:$0xff] %vm694_vm7, %v693_v4  ;;  %994 = vst.msk [vmem:[%s2033_s20 + $0x8] sm:$0xff] %vm694_vm7, %v750_v5 }
 0x3d2   : > { %1461 = shalt.err (!%p1458_p5)
}
 0x3d3   : > { %s1462_s0 = scalar_lea.hbm %s2057_s13, 256  ;;  %s1466_s9 = scalar_lea.hbm %s2214_s21, 1024 }
 0x3d4   : > { %p1463_p13 = scmp.ne.s32.totalorder %s2057_s13, %s1462_s0  ;;  %p1467_p11 = scmp.lt.u32.totalorder %s2057_s13, %s2214_s21 }
 0x3d5   : > { %p1468_p10 = scmp.lt.u32.totalorder %s1466_s9, %s1462_s0  ;;  %p1470_p6 = scmp.lt.u32.totalorder %s1462_s0, %s2057_s13 }
 0x3d6   : > { %p1464_p9 = pnand %p1463_p13, %p2215_p8 }
 0x3d7   : > { %p1469_p7 = por %p1468_p10, %p1467_p11 }
 0x3d8   : > { %p1465_p3 = pneg %p1464_p9 }
 0x3d9   : > { %p1471_p12 = por %p1470_p6, %p1469_p7 }
 0x3db   : > { %p1472_p1 = pnand %p1471_p12, %p1465_p3 }
 0x3dd   : > { %1475 = shalt.err (!%p1472_p1)
}
 0x3de   : > { %s1613_s28 = smov 128   ;;  %s1614_s10 = smov 8  }
 0x3df   : > { %1059 = dma.vmem_to_hbm [thread:$0]  (%p2215_p8), %s2059_s25, 256, %s2057_s13, %s2065_s8, %s1613_s28, %s1613_s28, %s1614_s10  }
 0x3e0 PF: > { %s2216_s18 = sld [smem:[#allocation34_spill]]  ;;  %s2217_s17 = sld [smem:[#allocation26_spill]] }
 0x3e1   : > { %s2218_s24 = sld [smem:[#allocation41_spill]] }
 0x3e6   : > { %p1102_p4 = scmp.ge.s32.totalorder %s2216_s18, 2  ;;  %s784_s27 = sand.u32 1, %s2217_s17  }
 0x3e7   : > { %p2219_p0 = scmp.ne.s32.totalorder %s2218_s24, 0  ;;  %s785_s23 = scalar_lea.sflag [#allocation8], %s784_s27 }
 0x3e9   : > { %p1088_p2 = pnand %p1102_p4, %p2219_p0 }
 0x3eb   : > { %1541 = dma.done.wait (!%p1088_p2), %s785_s23, 256  }
 0x3ec   : > { %1543 = vsyncadd (!%p1088_p2), %s785_s23, 4294967040  ;;  %s27_s15 = sadd.s32 1, %s2216_s18   ;;  %s2220_s27 = sld [smem:[#allocation27_spill]] }
 0x3ed   : > { %p24_p5 = scmp.ge.s32.totalorder %s27_s15, 6   ;;  %s2221_s28 = sld [smem:[#allocation28_spill]] }
 0x3ee   : > { %s2222_s29 = sld [smem:[#allocation40_spill]]  ;;  %s2223_s30 = sld [smem:[#allocation29_spill]] }
 0x3ef   : > { %s2224_s9 = sld [smem:[#allocation30_spill]]  ;;  %s2225_s10 = sld [smem:[#allocation39_spill]] }
 0x3f0   : > { %s2226_s11 = sld [smem:[#allocation33_spill]]  ;;  %s2227_s13 = sld [smem:[#allocation35_spill]] }
 0x3f1   : > { %s2228_s25 = sld [smem:[#allocation36_spill]]  ;;  %s2229_s12 = smov %s1582_s14 }
 0x3f2   :  { %26 = sbr.rel (!%p24_p5) target bundleno = 15 (0xf), region = 154 }
 0x3f7   : > { %s2230_s14 = smov %s2228_s25 }
 0x3f9   :  { %790 = vsyncpa [#allocation7], 1 }
 0x3fa   :  { %792 = vsyncpa [#allocation7 + $0x1], 1 }
 0x3fb   :  { %793 = vsyncpa [#allocation10], 1 }
 0x3fc   :  { %794 = vsyncpa [#allocation13], 1 }
 0x3fd   :  { %795 = vsyncpa [#allocation16], 1 }
 0x3fe   :  { %796 = vsyncpa [#allocation8], 1 }
 0x3ff   :  { %798 = vsyncpa [#allocation8 + $0x1], 1 }

</bundles_post_ra>
